<compile_context>
chip_gen: v7x
topology: tpu7x:2x2x1
jax: 0.10.0
libtpu: 0.0.40
codegen_flags: <defaults>
</compile_context>

<pallas_src>
import math
import functools

import jax
import jax.numpy as jnp
from jax.experimental import pallas as pl
from jax.experimental.pallas import tpu as pltpu

_LANE = 128
_DELTA_FACTOR = 0.7  # TWN threshold factor


# ----------------------------------------------------------------------------
# Kernels
# ----------------------------------------------------------------------------
def _make_stats_kernel(numel: float, delta_factor: float):
    """Two-pass global reduction: pass 0 -> sum|w|; pass 1 -> masked sums.

    Grid: (2, n_tiles).  Scratch (SMEM, f32[4]):
      [0] = running sum |w|
      [1] = delta
      [2] = running sum of |w| over mask
      [3] = running count over mask
    Output (SMEM, f32[2]): [delta, alpha].
    """
    inv_numel = float(1.0 / numel)

    def kernel(w_ref, out_ref, acc_ref):
        p = pl.program_id(0)
        i = pl.program_id(1)
        nt = pl.num_programs(1)

        @pl.when(jnp.logical_and(p == 0, i == 0))
        def _():
            acc_ref[0] = jnp.float32(0.0)
            acc_ref[1] = jnp.float32(0.0)
            acc_ref[2] = jnp.float32(0.0)
            acc_ref[3] = jnp.float32(0.0)
            out_ref[0] = jnp.float32(0.0)
            out_ref[1] = jnp.float32(0.0)

        aw = jnp.abs(w_ref[...].astype(jnp.float32))

        @pl.when(p == 0)
        def _():
            acc_ref[0] = acc_ref[0] + jnp.sum(aw)

        @pl.when(jnp.logical_and(p == 1, i == 0))
        def _():
            acc_ref[1] = jnp.float32(delta_factor * inv_numel) * acc_ref[0]
            acc_ref[2] = jnp.float32(0.0)
            acc_ref[3] = jnp.float32(0.0)

        @pl.when(p == 1)
        def _():
            delta = acc_ref[1]
            mask = (aw > delta).astype(jnp.float32)
            acc_ref[2] = acc_ref[2] + jnp.sum(aw * mask)
            acc_ref[3] = acc_ref[3] + jnp.sum(mask)

        @pl.when(jnp.logical_and(p == 1, i == nt - 1))
        def _():
            cnt = jnp.maximum(acc_ref[3], jnp.float32(1.0))
            out_ref[0] = acc_ref[1]           # delta
            out_ref[1] = acc_ref[2] / cnt     # alpha

    return kernel


def _apply_kernel(scal_ref, w_ref, o_ref):
    """out = alpha * sign(w) where |w| > delta, else 0.  Elementwise per tile."""
    delta = scal_ref[0]
    alpha = scal_ref[1]
    w = w_ref[...].astype(jnp.float32)
    aw = jnp.abs(w)
    signed = jnp.where(w > 0.0, alpha, -alpha)
    o_ref[...] = jnp.where(aw > delta, signed, jnp.float32(0.0)).astype(o_ref.dtype)


# ----------------------------------------------------------------------------
# Wrapper
# ----------------------------------------------------------------------------
def ternarize(w, *, tile_rows: int = 512, delta_factor: float = _DELTA_FACTOR):
    """Ternarize.forward for the quantized path (Weight_quant_forward != 'FP')."""
    assert tile_rows % 8 == 0, "tile_rows must be a multiple of 8 (sublane)"
    orig_shape = w.shape
    orig_dtype = w.dtype
    n = math.prod(orig_shape)

    # Lay the flattened weight out as a lane-dense (rows, 128) slab, zero-padded.
    # Zero padding is statistics-safe: it adds 0 to sum|w| (true numel is used as
    # the divisor) and never passes the strictly-greater threshold test.
    rows = -(-n // _LANE)
    rows8 = ((rows + 7) // 8) * 8
    if rows8 <= tile_rows:
        tm = rows8
        padded_rows = rows8
    else:
        tm = tile_rows
        padded_rows = ((rows8 + tm - 1) // tm) * tm
    num_tiles = padded_rows // tm

    flat = jnp.reshape(w, (-1,)).astype(jnp.float32)
    pad = padded_rows * _LANE - n
    if pad:
        flat = jnp.pad(flat, (0, pad))
    w2 = jnp.reshape(flat, (padded_rows, _LANE))

    # Pass 1: global statistics -> [delta, alpha] in SMEM.
    stats = pl.pallas_call(
        _make_stats_kernel(float(n), delta_factor),
        out_shape=jax.ShapeDtypeStruct((2,), jnp.float32),
        grid=(2, num_tiles),
        in_specs=[pl.BlockSpec((tm, _LANE), lambda p, i: (i, 0))],
        out_specs=pl.BlockSpec(memory_space=pltpu.MemorySpace.SMEM),
        scratch_shapes=[pltpu.SMEM((4,), jnp.float32)],
        compiler_params=pltpu.CompilerParams(
            dimension_semantics=("arbitrary", "arbitrary")),
    )(w2)

    # Pass 2: elementwise apply, tiles independent -> "parallel" grid axis.
    out2 = pl.pallas_call(
        _apply_kernel,
        out_shape=jax.ShapeDtypeStruct((padded_rows, _LANE), jnp.float32),
        grid=(num_tiles,),
        in_specs=[
            pl.BlockSpec(memory_space=pltpu.MemorySpace.SMEM),
            pl.BlockSpec((tm, _LANE), lambda i: (i, 0)),
        ],
        out_specs=pl.BlockSpec((tm, _LANE), lambda i: (i, 0)),
        compiler_params=pltpu.CompilerParams(
            dimension_semantics=("parallel",)),
    )(stats, w2)

    out = out2.reshape(-1)[:n].reshape(orig_shape).astype(orig_dtype)
    return out


def ternarize_module_forward(w, mode: str = "ESA", **kw):
    """Mirror of Ternarize.forward: identity for 'FP', quantize otherwise."""
    if mode == "FP":
        return w
    return ternarize(w, **kw)


# ----------------------------------------------------------------------------
# Pure-JAX reference (same math, whole-tensor reductions)
# ----------------------------------------------------------------------------
def _ternarize_ref(w, delta_factor=_DELTA_FACTOR):
    w32 = w.astype(jnp.float32)
    aw = jnp.abs(w32)
    delta = delta_factor * jnp.mean(aw)
    mask = aw > delta
    cnt = jnp.maximum(jnp.sum(mask.astype(jnp.float32)), 1.0)
    alpha = jnp.sum(jnp.where(mask, aw, 0.0)) / cnt
    return jnp.where(mask, jnp.sign(w32) * alpha, 0.0).astype(w.dtype)


# ----------------------------------------------------------------------------
if __name__ == "__main__":
    key = jax.random.PRNGKey(0)
    k1, k2 = jax.random.split(key)

    # Ternarize is applied to weight tensors; use small conv-weight-like shapes.
    w_small = jax.random.normal(k1, (16, 8, 3, 3), jnp.float32)       # single tile
    w_multi = jax.random.normal(k2, (64, 32, 3, 3), jnp.float32)      # multi-tile

    tern = jax.jit(functools.partial(ternarize, tile_rows=64))

    ok = True
    for w in (w_small, w_multi):
        out = jax.block_until_ready(tern(w))
        assert out.shape == w.shape and out.dtype == w.dtype
        assert bool(jnp.all(jnp.isfinite(out)))
        ref = _ternarize_ref(w)
        # Tolerate (rare) threshold-boundary flips from differing reduction order.
        frac_bad = float(jnp.mean((jnp.abs(out - ref) > 1e-4).astype(jnp.float32)))
        ok = ok and (frac_bad <= 1e-3)
    assert ok

    # FP path of the module forward is identity.
    assert bool(jnp.all(ternarize_module_forward(w_small, mode="FP") == w_small))

    print("KERNEL_OK")
</pallas_src>

<mosaic_0001>
module attributes {stable_mosaic.version = 11 : i64} {
  func.func @kernel(%arg0: i32, %arg1: i32, %arg2: memref<16x128xf32, #tpu.memory_space<vmem>>, %arg3: memref<2xf32, #tpu.memory_space<smem>>, %arg4: memref<4xf32, #tpu.memory_space<smem>>) attributes {dimension_semantics = [#tpu.dimension_semantics<arbitrary>, #tpu.dimension_semantics<arbitrary>], iteration_bounds = array<i64: 2, 1>, scalar_prefetch = 0 : i64, scratch_operands = 1 : i64, tpu.core_type = #tpu.core_type<tc>, window_params = [{transform_indices = @transform_0, window_bounds = array<i64: 16, 128>}, {transform_indices = @transform_1, window_bounds = array<i64: 2>}]} {
    %c0_i32 = arith.constant 0 : i32
    %0 = arith.cmpi eq, %arg0, %c0_i32 : i32
    %c0_i32_0 = arith.constant 0 : i32
    %1 = arith.cmpi eq, %arg1, %c0_i32_0 : i32
    %2 = arith.andi %0, %1 : i1
    %3 = arith.extui %2 : i1 to i32
    %c0_i32_1 = arith.constant 0 : i32
    %4 = arith.cmpi ne, %3, %c0_i32_1 : i32
    scf.if %4 {
      %cst = arith.constant 0.000000e+00 : f32
      %c0_12 = arith.constant 0 : index
      %23 = memref.load %arg4[%c0_12] : memref<4xf32, #tpu.memory_space<smem>>
      memref.store %cst, %arg4[%c0_12] : memref<4xf32, #tpu.memory_space<smem>>
      %cst_13 = arith.constant 0.000000e+00 : f32
      %c1 = arith.constant 1 : index
      %24 = memref.load %arg4[%c1] : memref<4xf32, #tpu.memory_space<smem>>
      memref.store %cst_13, %arg4[%c1] : memref<4xf32, #tpu.memory_space<smem>>
      %cst_14 = arith.constant 0.000000e+00 : f32
      %c2 = arith.constant 2 : index
      %25 = memref.load %arg4[%c2] : memref<4xf32, #tpu.memory_space<smem>>
      memref.store %cst_14, %arg4[%c2] : memref<4xf32, #tpu.memory_space<smem>>
      %cst_15 = arith.constant 0.000000e+00 : f32
      %c3 = arith.constant 3 : index
      %26 = memref.load %arg4[%c3] : memref<4xf32, #tpu.memory_space<smem>>
      memref.store %cst_15, %arg4[%c3] : memref<4xf32, #tpu.memory_space<smem>>
      %cst_16 = arith.constant 0.000000e+00 : f32
      %c0_17 = arith.constant 0 : index
      %27 = memref.load %arg3[%c0_17] : memref<2xf32, #tpu.memory_space<smem>>
      memref.store %cst_16, %arg3[%c0_17] : memref<2xf32, #tpu.memory_space<smem>>
      %cst_18 = arith.constant 0.000000e+00 : f32
      %c1_19 = arith.constant 1 : index
      %28 = memref.load %arg3[%c1_19] : memref<2xf32, #tpu.memory_space<smem>>
      memref.store %cst_18, %arg3[%c1_19] : memref<2xf32, #tpu.memory_space<smem>>
    } else {
    }
    %c0 = arith.constant 0 : index
    %c0_2 = arith.constant 0 : index
    %5 = vector.load %arg2[%c0, %c0_2] : memref<16x128xf32, #tpu.memory_space<vmem>>, vector<16x128xf32>
    %6 = math.absf %5 : vector<16x128xf32>
    %c0_i32_3 = arith.constant 0 : i32
    %7 = arith.cmpi eq, %arg0, %c0_i32_3 : i32
    %8 = arith.extui %7 : i1 to i32
    %c0_i32_4 = arith.constant 0 : i32
    %9 = arith.cmpi ne, %8, %c0_i32_4 : i32
    scf.if %9 {
      %c0_12 = arith.constant 0 : index
      %23 = memref.load %arg4[%c0_12] : memref<4xf32, #tpu.memory_space<smem>>
      %24 = vector.shape_cast %6 : vector<16x128xf32> to vector<1x16x128xf32>
      %cst = arith.constant dense<0.000000e+00> : vector<1xf32>
      %25 = vector.multi_reduction <add>, %24, %cst [1, 2] : vector<1x16x128xf32> to vector<1xf32>
      %26 = vector.shape_cast %25 : vector<1xf32> to vector<1x1x1xf32>
      %27 = vector.extract %26[0, 0, 0] : f32 from vector<1x1x1xf32>
      %28 = arith.addf %23, %27 : f32
      %c0_13 = arith.constant 0 : index
      %29 = memref.load %arg4[%c0_13] : memref<4xf32, #tpu.memory_space<smem>>
      memref.store %28, %arg4[%c0_13] : memref<4xf32, #tpu.memory_space<smem>>
    } else {
    }
    %c1_i32 = arith.constant 1 : i32
    %10 = arith.cmpi eq, %arg0, %c1_i32 : i32
    %c0_i32_5 = arith.constant 0 : i32
    %11 = arith.cmpi eq, %arg1, %c0_i32_5 : i32
    %12 = arith.andi %10, %11 : i1
    %13 = arith.extui %12 : i1 to i32
    %c0_i32_6 = arith.constant 0 : i32
    %14 = arith.cmpi ne, %13, %c0_i32_6 : i32
    scf.if %14 {
      %c0_12 = arith.constant 0 : index
      %23 = memref.load %arg4[%c0_12] : memref<4xf32, #tpu.memory_space<smem>>
      %cst = arith.constant 6.07638911E-4 : f32
      %24 = arith.mulf %cst, %23 : f32
      %c1 = arith.constant 1 : index
      %25 = memref.load %arg4[%c1] : memref<4xf32, #tpu.memory_space<smem>>
      memref.store %24, %arg4[%c1] : memref<4xf32, #tpu.memory_space<smem>>
      %cst_13 = arith.constant 0.000000e+00 : f32
      %c2 = arith.constant 2 : index
      %26 = memref.load %arg4[%c2] : memref<4xf32, #tpu.memory_space<smem>>
      memref.store %cst_13, %arg4[%c2] : memref<4xf32, #tpu.memory_space<smem>>
      %cst_14 = arith.constant 0.000000e+00 : f32
      %c3 = arith.constant 3 : index
      %27 = memref.load %arg4[%c3] : memref<4xf32, #tpu.memory_space<smem>>
      memref.store %cst_14, %arg4[%c3] : memref<4xf32, #tpu.memory_space<smem>>
    } else {
    }
    %c1_i32_7 = arith.constant 1 : i32
    %15 = arith.cmpi eq, %arg0, %c1_i32_7 : i32
    %16 = arith.extui %15 : i1 to i32
    %c0_i32_8 = arith.constant 0 : i32
    %17 = arith.cmpi ne, %16, %c0_i32_8 : i32
    scf.if %17 {
      %c1 = arith.constant 1 : index
      %23 = memref.load %arg4[%c1] : memref<4xf32, #tpu.memory_space<smem>>
      %24 = vector.broadcast %23 : f32 to vector<16x128xf32>
      %25 = arith.cmpf ogt, %6, %24 : vector<16x128xf32>
      %26 = arith.extui %25 : vector<16x128xi1> to vector<16x128xi32>
      %27 = arith.sitofp %26 : vector<16x128xi32> to vector<16x128xf32>
      %c2 = arith.constant 2 : index
      %28 = memref.load %arg4[%c2] : memref<4xf32, #tpu.memory_space<smem>>
      %29 = arith.mulf %6, %27 : vector<16x128xf32>
      %30 = vector.shape_cast %29 : vector<16x128xf32> to vector<1x16x128xf32>
      %cst = arith.constant dense<0.000000e+00> : vector<1xf32>
      %31 = vector.multi_reduction <add>, %30, %cst [1, 2] : vector<1x16x128xf32> to vector<1xf32>
      %32 = vector.shape_cast %31 : vector<1xf32> to vector<1x1x1xf32>
      %33 = vector.extract %32[0, 0, 0] : f32 from vector<1x1x1xf32>
      %34 = arith.addf %28, %33 : f32
      %c2_12 = arith.constant 2 : index
      %35 = memref.load %arg4[%c2_12] : memref<4xf32, #tpu.memory_space<smem>>
      memref.store %34, %arg4[%c2_12] : memref<4xf32, #tpu.memory_space<smem>>
      %c3 = arith.constant 3 : index
      %36 = memref.load %arg4[%c3] : memref<4xf32, #tpu.memory_space<smem>>
      %37 = vector.shape_cast %27 : vector<16x128xf32> to vector<1x16x128xf32>
      %cst_13 = arith.constant dense<0.000000e+00> : vector<1xf32>
      %38 = vector.multi_reduction <add>, %37, %cst_13 [1, 2] : vector<1x16x128xf32> to vector<1xf32>
      %39 = vector.shape_cast %38 : vector<1xf32> to vector<1x1x1xf32>
      %40 = vector.extract %39[0, 0, 0] : f32 from vector<1x1x1xf32>
      %41 = arith.addf %36, %40 : f32
      %c3_14 = arith.constant 3 : index
      %42 = memref.load %arg4[%c3_14] : memref<4xf32, #tpu.memory_space<smem>>
      memref.store %41, %arg4[%c3_14] : memref<4xf32, #tpu.memory_space<smem>>
    } else {
    }
    %c1_i32_9 = arith.constant 1 : i32
    %18 = arith.cmpi eq, %arg0, %c1_i32_9 : i32
    %c0_i32_10 = arith.constant 0 : i32
    %19 = arith.cmpi eq, %arg1, %c0_i32_10 : i32
    %20 = arith.andi %18, %19 : i1
    %21 = arith.extui %20 : i1 to i32
    %c0_i32_11 = arith.constant 0 : i32
    %22 = arith.cmpi ne, %21, %c0_i32_11 : i32
    scf.if %22 {
      %c3 = arith.constant 3 : index
      %23 = memref.load %arg4[%c3] : memref<4xf32, #tpu.memory_space<smem>>
      %cst = arith.constant 1.000000e+00 : f32
      %24 = arith.maximumf %23, %cst : f32
      %c1 = arith.constant 1 : index
      %25 = memref.load %arg4[%c1] : memref<4xf32, #tpu.memory_space<smem>>
      %c0_12 = arith.constant 0 : index
      %26 = memref.load %arg3[%c0_12] : memref<2xf32, #tpu.memory_space<smem>>
      memref.store %25, %arg3[%c0_12] : memref<2xf32, #tpu.memory_space<smem>>
      %c2 = arith.constant 2 : index
      %27 = memref.load %arg4[%c2] : memref<4xf32, #tpu.memory_space<smem>>
      %28 = arith.divf %27, %24 : f32
      %c1_13 = arith.constant 1 : index
      %29 = memref.load %arg3[%c1_13] : memref<2xf32, #tpu.memory_space<smem>>
      memref.store %28, %arg3[%c1_13] : memref<2xf32, #tpu.memory_space<smem>>
    } else {
    }
    return
  }
  func.func @transform_0(%arg0: i32, %arg1: i32) -> (i32, i32) {
    %c0_i32 = arith.constant 0 : i32
    %c0_i32_0 = arith.constant 0 : i32
    return %arg1, %c0_i32 : i32, i32
  }
  func.func @transform_1(%arg0: i32, %arg1: i32) -> i32 {
    %c0_i32 = arith.constant 0 : i32
    %c0_i32_0 = arith.constant 0 : i32
    return %c0_i32 : i32
  }
}

module attributes {stable_mosaic.version = 11 : i64} {
  func.func @_apply_kernel(%arg0: i32, %arg1: memref<2xf32, #tpu.memory_space<smem>>, %arg2: memref<16x128xf32, #tpu.memory_space<vmem>>, %arg3: memref<16x128xf32, #tpu.memory_space<vmem>>) attributes {dimension_semantics = [#tpu.dimension_semantics<parallel>], iteration_bounds = array<i64: 1>, scalar_prefetch = 0 : i64, scratch_operands = 0 : i64, tpu.core_type = #tpu.core_type<tc>, window_params = [{transform_indices = @transform_0, window_bounds = array<i64: 2>}, {transform_indices = @transform_1, window_bounds = array<i64: 16, 128>}, {transform_indices = @transform_2, window_bounds = array<i64: 16, 128>}]} {
    %c0 = arith.constant 0 : index
    %0 = memref.load %arg1[%c0] : memref<2xf32, #tpu.memory_space<smem>>
    %c1 = arith.constant 1 : index
    %1 = memref.load %arg1[%c1] : memref<2xf32, #tpu.memory_space<smem>>
    %c0_0 = arith.constant 0 : index
    %c0_1 = arith.constant 0 : index
    %2 = vector.load %arg2[%c0_0, %c0_1] : memref<16x128xf32, #tpu.memory_space<vmem>>, vector<16x128xf32>
    %3 = math.absf %2 : vector<16x128xf32>
    %cst = arith.constant 0.000000e+00 : f32
    %4 = vector.broadcast %cst : f32 to vector<16x128xf32>
    %5 = arith.cmpf ogt, %2, %4 : vector<16x128xf32>
    %cst_2 = arith.constant 0.000000e+00 : f32
    %6 = arith.subf %cst_2, %1 : f32
    %7 = vector.broadcast %1 : f32 to vector<16x128xf32>
    %8 = vector.broadcast %6 : f32 to vector<16x128xf32>
    %9 = arith.select %5, %7, %8 : vector<16x128xi1>, vector<16x128xf32>
    %10 = vector.broadcast %0 : f32 to vector<16x128xf32>
    %11 = arith.cmpf ogt, %3, %10 : vector<16x128xf32>
    %cst_3 = arith.constant 0.000000e+00 : f32
    %12 = vector.broadcast %cst_3 : f32 to vector<16x128xf32>
    %13 = arith.select %11, %9, %12 : vector<16x128xi1>, vector<16x128xf32>
    %c0_4 = arith.constant 0 : index
    %c0_5 = arith.constant 0 : index
    %14 = vector.load %arg3[%c0_4, %c0_5] : memref<16x128xf32, #tpu.memory_space<vmem>>, vector<16x128xf32>
    tpu.vector_store %arg3[%c0_4, %c0_5], %13 {strides = array<i32>} : memref<16x128xf32, #tpu.memory_space<vmem>>, vector<16x128xf32>,
    return
  }
  func.func @transform_0(%arg0: i32) -> i32 {
    %c0_i32 = arith.constant 0 : i32
    %c0_i32_0 = arith.constant 0 : i32
    return %c0_i32 : i32
  }
  func.func @transform_1(%arg0: i32) -> (i32, i32) {
    %c0_i32 = arith.constant 0 : i32
    %c0_i32_0 = arith.constant 0 : i32
    return %arg0, %c0_i32 : i32, i32
  }
  func.func @transform_2(%arg0: i32) -> (i32, i32) {
    %c0_i32 = arith.constant 0 : i32
    %c0_i32_0 = arith.constant 0 : i32
    return %arg0, %c0_i32 : i32, i32
  }
}

</mosaic_0001>

<bundles_post_ra>
// kernel: ternarize.2
= control target key start
LH: loop header
LB: loop body
LE: loop exit
PB: predicated region body
PF: predicated region fallthrough
CT: control target
= control target key end

     0   :  { %6 = vsyncpa [#allocation4], 0  ;;  %s414_s6 = smov 0   ;;  %s416_s7 = smov 0   ;;  %s479_s0 = inlined_call_operand.vmem [shape: f32[16,128], index: 0, kind: input, shape index: {}]   ;;  %s480_s1 = inlined_call_operand.vmem [shape: f32[2], index: 1, kind: output, shape index: {}]  }
   0x1   :  { %s418_s8 = smov 0  }
   0x2 LB: > { %s283_s9 = sadd.s32 4294967295, %s398_s8   ;;  %s24_s10 = sadd.s32 1, %s394_s7  ;;  %s398_s8 = sphi %s418_s8, %s12_s8   ;;  %s394_s7 = sphi %s416_s7, %s483_s7   ;;  %s390_s6 = sphi %s414_s6, %s482_s6  }
   0x3   : > { %p26_p0 = scmp.ge.s32.totalorder %s24_s10, 2  ;;  %p286_p1 = scmp.ge.s32.totalorder %s398_s8, 1 }
   0x4   : > { %p96_p2 = scmp.lt.s32.totalorder %s398_s8, 3 }
   0x5   : > { %s485_s10 = smov (%p26_p0, %s24_s10), 0 }
   0x6   : > { %p97_p3 = pnand %p286_p1, %p96_p2 }
   0x7   : > { %p117_p4 = scmp.eq.s32.totalorder (!%p97_p3), %s390_s6, 0  ;;  %v135_v0 = vld [vmem:[%s479_s0] sm:$0xff] (!%p97_p3)  ;;  %v136_v1 = vld [vmem:[%s479_s0 + $0x8] sm:$0xff] (!%p97_p3)  ;;  %s400_s15 = smov (!%p97_p3), 0.0  }
   0x8   : > { %100 = sbr.rel (%p97_p3) target bundleno = 546 (0x222), region = 24  ;;  %v137_v2 = vand.u32 (!%p97_p3), 2147483647, %v135_v0  ;;  %v138_v3 = vand.u32 (!%p97_p3), 2147483647, %v136_v1  ;;  %p288_p5 = scmp.ne.s32.totalorder (!%p97_p3), %s390_s6, 0 }
   0xf   : > { %313 = sst [smem:[#allocation2]] (%p117_p4), %s400_s15  ;;  %141 = sbr.rel (%p288_p5) target bundleno = 225 (0xe1), region = 32 }
  0x10   : > { %314 = sst [smem:[#allocation2 + $0x1]] (%p117_p4), %s400_s15  ;;  %v143_v4 = vadd.f32 (!%p288_p5), %v138_v3, %v137_v2  ;;  %s142_s16 = sld [smem:[#allocation2]] (!%p288_p5) }
  0x11   : > { %315 = sst [smem:[#allocation2 + $0x2]] (%p117_p4), %s400_s15 }
  0x12   : > { %316 = sst [smem:[#allocation2 + $0x3]] (%p117_p4), %s400_s15  ;;  %144 = vadd.xlane.f32.xlu0 (!%p288_p5), %v143_v4 }
  0x13   : > { %317 = sst [smem:[#allocation3]] (%p117_p4), %s400_s15 }
  0x14   : > { %318 = sst [smem:[#allocation3 + $0x1]] (%p117_p4), %s400_s15 }
  0x9f   : > { %v145_v5 = vpop.xlane.xlu0 %144 }
  0xa0   : > { %v146_v6 = vrot.slane %v145_v5, 4 }
  0xa2   : > { %v147_v7 = vadd.f32 %v146_v6, %v145_v5 }
  0xa4   : > { %v148_v8 = vrot.slane %v147_v7, 2 }
  0xa6   : > { %v149_v9 = vadd.f32 %v148_v8, %v147_v7 }
  0xa8   : > { %v150_v10 = vrot.slane %v149_v9, 1 }
  0xaa   : > { %v151_v11 = vadd.f32 %v150_v10, %v149_v9 }
  0xac   : > { %305 = vpush %v151_v11 }
  0xdd   : > { %s306_s17 = spop %305 }
  0xde   : > { %s153_s18 = sadd.f32 %s306_s17, %s142_s16 }
  0xe0   : > { %155 = sst [smem:[#allocation2]] %s153_s18 }
  0xe1 PF: > { %p156_p6 = scmp.eq.s32.totalorder %s390_s6, 1  ;;  %s161_s19 = sld [smem:[#allocation2]] }
  0xe2   : > { %p290_p7 = scmp.ne.s32.totalorder %s390_s6, 1 }
  0xe3   : > { %320 = sst [smem:[#allocation2 + $0x2]] (%p156_p6), %s400_s15  ;;  %v401_v13 = vmov (!%p290_p7), 0.0  }
  0xe4   : > { %321 = sst [smem:[#allocation2 + $0x3]] (%p156_p6), %s400_s15  ;;  %171 = sbr.rel (%p290_p7) target bundleno = 458 (0x1ca), region = 40 }
  0xe5   : > { %s294_s22 = sld [smem:[#allocation2 + $0x2]] (!%p290_p7)  ;;  %s295_s23 = sld [smem:[#allocation2 + $0x3]] (!%p290_p7) }
  0xe7   : > { %s162_s20 = smul.f32 0.0006076389, %s161_s19 }
  0xe9   : > { %319 = sst [smem:[#allocation2 + $0x1]] (%p156_p6), %s162_s20 }
  0xea   : > { %s291_s21 = sld [smem:[#allocation2 + $0x1]] (!%p290_p7) }
  0xf0   : > { %v173_v12 = vstv %s291_s21 }
  0xf1   : > { %vm174_vm0 = vcmp.gt.f32.partialorder %v137_v2, %v173_v12  ;;  %vm175_vm1 = vcmp.gt.f32.partialorder %v138_v3, %v173_v12 }
  0xf2   : > { %v292_v14 = vsel %vm174_vm0, 1.0, %v401_v13  ;;  %v293_v15 = vsel %vm175_vm1, 1.0, %v401_v13 }
  0xf3   : > { %v181_v16 = vmul.f32 %v292_v14, %v137_v2  ;;  %v182_v17 = vmul.f32 %v293_v15, %v138_v3  ;;  %v197_v19 = vadd.f32 %v293_v15, %v292_v14 }
  0xf5   : > { %v183_v18 = vadd.f32 %v182_v17, %v181_v16 }
  0xf7   : > { %184 = vadd.xlane.f32.xlu0 %v183_v18 }
  0xfb   : > { %198 = vadd.xlane.f32.xlu0 %v197_v19 }
 0x184   : > { %v185_v20 = vpop.xlane.xlu0 %184 }
 0x185   : > { %v186_v21 = vrot.slane %v185_v20, 4 }
 0x187   : > { %v187_v22 = vadd.f32 %v186_v21, %v185_v20 }
 0x188   : > { %v199_v23 = vpop.xlane.xlu0 %198 }
 0x189   : > { %v188_v24 = vrot.slane %v187_v22, 2  ;;  %v200_v25 = vrot.slane %v199_v23, 4 }
 0x18b   : > { %v201_v26 = vadd.f32 %v200_v25, %v199_v23  ;;  %v189_v27 = vadd.f32 %v188_v24, %v187_v22 }
 0x18d   : > { %v202_v28 = vrot.slane %v201_v26, 2  ;;  %v190_v29 = vrot.slane %v189_v27, 1 }
 0x18f   : > { %v203_v30 = vadd.f32 %v202_v28, %v201_v26  ;;  %v191_v31 = vadd.f32 %v190_v29, %v189_v27 }
 0x191   : > { %307 = vpush %v191_v31  ;;  %v204_v32 = vrot.slane %v203_v30, 1 }
 0x193   : > { %v205_v33 = vadd.f32 %v204_v32, %v203_v30 }
 0x195   : > { %309 = vpush %v205_v33 }
 0x1c2   : > { %s308_s24 = spop %307 }
 0x1c3   : > { %s193_s25 = sadd.f32 %s308_s24, %s294_s22 }
 0x1c5   : > { %195 = sst [smem:[#allocation2 + $0x2]] %s193_s25 }
 0x1c6   : > { %s310_s26 = spop %309 }
 0x1c7   : > { %s207_s27 = sadd.f32 %s310_s26, %s295_s23 }
 0x1c9   : > { %209 = sst [smem:[#allocation2 + $0x3]] %s207_s27 }
 0x1ca PF: > { %211 = sbr.rel (!%p156_p6) target bundleno = 530 (0x212), region = 44  ;;  %s296_s28 = sld [smem:[#allocation2 + $0x3]] (%p156_p6) }
 0x1cb   : > { %s297_s29 = sld [smem:[#allocation2 + $0x1]] (%p156_p6)  ;;  %s402_s30 = smov (%p156_p6), 1.0  }
 0x1cc   : > { %s298_s3 = sld [smem:[#allocation2 + $0x2]] (%p156_p6) }
 0x1d0   : > { %s213_s2 = smax.f32 (%p156_p6), %s402_s30, %s296_s28 }
 0x1d1   : > { %216 = sst [smem:[#allocation3]] %s297_s29  ;;  %v218_v34 = vstv %s213_s2 }
 0x1d2   : > { %356 = vrcp.f32 %v218_v34 }
 0x1dc   : > { %v357_v35 = vpop.eup %356 }
 0x1dd   : > { %311 = vpush %v357_v35 }
 0x20e   : > { %s312_s4 = spop %311 }
 0x20f   : > { %s221_s5 = smul.f32 %s312_s4, %s298_s3 }
 0x211   : > { %223 = sst [smem:[#allocation3 + $0x1]] %s221_s5 }
 0x212 PF: > { %p455_p8 = scmp.eq.s32.totalorder %s283_s9, 1  ;;  %s231_s13 = sshll.u32 %s480_s1, 4  ;;  %s232_s13 = int_to_ptr.vmem [resolvable:$true] %s231_s13 }
 0x213   : > { %s358_s14 = scalar_lea.vmem %s232_s13, 16  ;;  %p365_p12 = scmp.lt.s32.totalorder %s232_s13, %s232_s13 }
 0x214   : > { %p359_p9 = scmp.ne.s32.totalorder %s232_s13, %s358_s14  ;;  %p366_p13 = scmp.lt.s32.totalorder %s358_s14, %s358_s14 }
 0x216   : > { %p360_p10 = pnand %p359_p9, %p455_p8  ;;  %p367_p0 = por %p366_p13, %p365_p12 }
 0x218   : > { %p361_p11 = pneg %p360_p10 }
 0x21a   : > { %p368_p1 = pnand %p367_p0, %p361_p11 }
 0x21c   : > { %371 = shalt.err (!%p368_p1)
}
 0x21d   : > { %s403_s9 = smov [#allocation3]  }
 0x21e   : > { %323 = dma.smem_to_vmem (%p455_p8), %s403_s9, 16, %s232_s13, [#allocation4]  }
 0x21f   : > { %385 = dma.done.wait (%p455_p8), [#allocation4], 16  }
 0x220   : > { %387 = vsyncadd (%p455_p8), [#allocation4], 4294967280 }
 0x221   : > { %239 = sfence }
 0x222 PF: > { %s12_s8 = sadd.s32 1, %s398_s8   ;;  %s482_s6 = smov %s394_s7 }
 0x223   : > { %p9_p2 = scmp.ge.s32.totalorder %s12_s8, 4   ;;  %s483_s7 = smov %s485_s10 }
 0x225   :  { %11 = sbr.rel (!%p9_p2) target bundleno = 2 (0x2), region = 85 }
 0x22c   :  { %245 = vsyncpa [#allocation4], 1 }
 0x22d   :  { %247 = vsyncpa [#allocation4 + $0x1], 1 }

// kernel: ternarize.3
= control target key start
LH: loop header
LB: loop body
LE: loop exit
PB: predicated region body
PF: predicated region fallthrough
CT: control target
= control target key end

     0   :  { %7 = vsyncpa [#allocation3], 0  ;;  %s96_s0 = inlined_call_operand.vmem [shape: f32[2], index: 0, kind: input, shape index: {}]   ;;  %s97_s1 = inlined_call_operand.vmem [shape: f32[16,128], index: 1, kind: input, shape index: {}]   ;;  %s98_s2 = inlined_call_operand.vmem [shape: f32[16,128], index: 2, kind: output, shape index: {}]  }
   0x1   :  { %s14_s11 = sshll.u32 %s96_s0, 4  ;;  %s15_s11 = int_to_ptr.vmem [resolvable:$true] %s14_s11 }
   0x2   :  { %s51_s12 = scalar_lea.vmem %s15_s11, 16  ;;  %p56_p1 = scmp.lt.s32.totalorder %s15_s11, %s15_s11 }
   0x3   :  { %p52_p0 = scmp.ne.s32.totalorder %s15_s11, %s51_s12  ;;  %p57_p2 = scmp.lt.s32.totalorder %s51_s12, %s51_s12 }
   0x5   :  { %p58_p3 = por %p57_p2, %p56_p1 }
   0x7   :  { %p59_p4 = pnand %p58_p3, %p52_p0 }
   0x9   :  { %62 = shalt.err (!%p59_p4)
}
   0xa   :  { %s65_s13 = smov [#allocation2]  }
   0xb   :  { %17 = dma.vmem_to_smem %s15_s11, 16, %s65_s13, [#allocation3]  }
   0xc   :  { %63 = dma.done.wait [#allocation3], 16  }
   0xd   :  { %64 = vsyncadd [#allocation3], 4294967280 }
   0xe   :  { %23 = sfence }
   0xf   :  { %s24_s14 = sld [smem:[#allocation2]]  ;;  %s49_s15 = sld [smem:[#allocation2 + $0x1]]  ;;  %v26_v0 = vld [vmem:[%s97_s1] sm:$0xff]  ;;  %v27_v1 = vld [vmem:[%s97_s1 + $0x8] sm:$0xff] }
  0x10   :  { %v28_v2 = vand.u32 2147483647, %v26_v0  ;;  %v29_v3 = vand.u32 2147483647, %v27_v1  ;;  %vm30_vm0 = vcmp.gt.f32.partialorder %v26_v0, 0.0  ;;  %vm31_vm1 = vcmp.gt.f32.partialorder %v27_v1, 0.0 }
  0x15   :  { %s32_s19 = ssub.f32 0.0, %s49_s15  ;;  %v33_v4 = vstv %s49_s15  ;;  %v37_v5 = vstv %s24_s14 }
  0x16   :  { %vm38_vm2 = vcmp.gt.f32.partialorder %v28_v2, %v37_v5  ;;  %vm39_vm3 = vcmp.gt.f32.partialorder %v29_v3, %v37_v5 }
  0x17   :  { %v34_v6 = vstv %s32_s19 }
  0x18   :  { %v35_v7 = vsel %vm30_vm0, %v33_v4, %v34_v6  ;;  %v36_v8 = vsel %vm31_vm1, %v33_v4, %v34_v6 }
  0x19   :  { %v40_v9 = vsel %vm38_vm2, %v35_v7, 0.0  ;;  %v41_v10 = vsel %vm39_vm3, %v36_v8, 0.0 }
  0x1a   :  { %42 = vst [vmem:[%s98_s2] sm:$0xff] %v40_v9  ;;  %43 = vst [vmem:[%s98_s2 + $0x8] sm:$0xff] %v41_v10 }
  0x1b   :  { %48 = vsyncpa [#allocation3], 1 }

</bundles_post_ra>
